<compile_context>
chip_gen: v6e
topology: v6e:2x2x1
jax: 0.10.0
libtpu: 0.0.40
codegen_flags: <defaults>
</compile_context>

<pallas_src>
import functools

import jax
import jax.numpy as jnp
from jax.experimental import pallas as pl
from jax.experimental.pallas import tpu as pltpu


def _ru(x, m):
    return (x + m - 1) // m * m


def _cdiv(a, b):
    return (a + b - 1) // b


def _vmem_budget():
    """Generation-aware VMEM sizing -> (tile-planning budget, vmem_limit_bytes)."""
    cap = 64 * 1024 * 1024  # conservative fallback (v7x per-core VMEM)
    try:
        info = pltpu.get_tpu_info()
        cap = int(getattr(info, "vmem_capacity_bytes", cap))
    except Exception:
        pass
    # v5e/v6e (128 MiB): limit ~100 MiB, budget ~64 MiB.  v7x (64 MiB): limit 48, budget 40.
    limit = max(min(cap - 16 * 1024 * 1024, 100 * 1024 * 1024), 24 * 1024 * 1024)
    budget = max(min(limit - 8 * 1024 * 1024, 64 * 1024 * 1024), 16 * 1024 * 1024)
    return budget, limit


# --------------------------------------------------------------------------------------
# Kernels
# --------------------------------------------------------------------------------------
def _ffn_resident_kernel(*refs, n_layers, negative_slope, act_last, compute_dtype):
    """Fused n-layer FFN on one (tile_m, d_in) row tile; all weights resident in VMEM.

    refs = (x_ref, w0_ref, b0_ref, ..., w_{n-1}_ref, b_{n-1}_ref, o_ref).
    MXU matmuls with f32 accumulation; bias + LeakyReLU epilogue in f32 on the VPU.
    """
    x_ref, o_ref = refs[0], refs[-1]
    wb = refs[1:-1]

    h = x_ref[...]
    if h.dtype != compute_dtype:          # in-kernel cast: stream x at its HBM dtype
        h = h.astype(compute_dtype)
    for i in range(n_layers):
        w_ref = wb[2 * i]
        b_ref = wb[2 * i + 1]
        y = jnp.dot(h, w_ref[...], preferred_element_type=jnp.float32) + b_ref[...]
        last = i == n_layers - 1
        if (not last) or act_last:
            y = jnp.maximum(y, negative_slope * y)   # LeakyReLU as a single vmax
        if last:
            o_ref[...] = y.astype(o_ref.dtype)
        else:
            h = y.astype(compute_dtype)              # feed next MXU matmul


def _ffn2_chunked_kernel(x_ref, w1_ref, b1_ref, w2_ref, b2_ref, o_ref, acc_ref,
                         *, negative_slope, compute_dtype):
    """2-layer FFN with the hidden dim chunked over grid axis 1 (reduction axis).

    acc_ref: f32 (tile_m, d_out) accumulator scratch, resident across hidden chunks.
    Hidden padding columns are exact zeros (0 weight, 0 bias -> LeakyReLU(0)=0 -> 0 rows
    of W2), so padded chunks contribute nothing.
    """
    h_idx = pl.program_id(1)

    @pl.when(h_idx == 0)
    def _init():
        acc_ref[...] = jnp.zeros_like(acc_ref)

    x = x_ref[...]
    if x.dtype != compute_dtype:
        x = x.astype(compute_dtype)
    y = jnp.dot(x, w1_ref[...], preferred_element_type=jnp.float32) + b1_ref[...]
    y = jnp.maximum(y, negative_slope * y)
    acc_ref[...] += jnp.dot(y.astype(compute_dtype), w2_ref[...],
                            preferred_element_type=jnp.float32)

    @pl.when(h_idx == pl.num_programs(1) - 1)
    def _finalize():
        o_ref[...] = (acc_ref[...] + b2_ref[...]).astype(o_ref.dtype)


# --------------------------------------------------------------------------------------
# Wrapper
# --------------------------------------------------------------------------------------
def positionwise_feed_forward(x, weights, biases, *, negative_slope=0.1,
                              compute_dtype=None, max_tile_m=1024, hidden_chunk=None):
    """Pallas implementation of PositionwiseFeedForward.forward (eval mode).

    x:       (..., d_input)
    weights: list of (d_in_i, d_out_i) arrays (transpose of torch Linear.weight)
    biases:  list of (d_out_i,) or (1, d_out_i) arrays
    compute_dtype: MXU feed dtype. Default ("auto"): bf16 when x & weights are f32
                   (f32 accumulation), otherwise the promoted parameter dtype.
    hidden_chunk:  optional hidden-dim chunk size (multiple of 128) to force the
                   chunked path for n_layers == 2.
    """
    n_layers = len(weights)
    if n_layers == 0:
        return x

    out_dtype = x.dtype
    lead = x.shape[:-1]
    d_in = int(x.shape[-1])
    dims = [d_in] + [int(w.shape[1]) for w in weights]
    d_out = dims[-1]

    if compute_dtype is not None:
        cdt = jnp.dtype(compute_dtype)
    else:
        promoted = jnp.result_type(x.dtype, *[w.dtype for w in weights])
        cdt = (jnp.dtype(jnp.bfloat16) if promoted == jnp.dtype(jnp.float32)
               else jnp.dtype(promoted))

    x2d = x.reshape(-1, d_in)                       # no pad, no cast (cast in-kernel)
    M = int(x2d.shape[0])
    ws = [w.astype(cdt) for w in weights]           # small one-time casts (resident params)
    bs = [jnp.reshape(b, (1, -1)).astype(jnp.float32) for b in biases]

    budget, vmem_limit = _vmem_budget()
    row_mult = 8
    cbytes = cdt.itemsize
    xbytes = jnp.dtype(x2d.dtype).itemsize
    obytes = jnp.dtype(out_dtype).itemsize
    lane = [_ru(d, 128) for d in dims]              # VMEM lane-padded widths for estimates

    # resident-weights VMEM cost (conservative 2x: double-buffered constant-index blocks)
    w_vmem = sum(_ru(dims[i], 8) * lane[i + 1] for i in range(n_layers)) * cbytes
    b_vmem = sum(8 * lane[i + 1] for i in range(n_layers)) * 4
    fixed_resident = 2 * (w_vmem + b_vmem)

    use_chunked = (n_layers == 2) and (hidden_chunk is not None
                                       or fixed_resident > budget // 2)

    flops = 2 * M * sum(dims[i] * dims[i + 1] for i in range(n_layers))
    bytes_accessed = (x2d.size * xbytes + sum(int(w.size) * cbytes for w in ws)
                      + sum(int(b.size) * 4 for b in bs) + M * d_out * obytes)
    cost = pl.CostEstimate(flops=int(flops), transcendentals=0,
                           bytes_accessed=int(bytes_accessed))

    def _solve_tile_m(fixed, per_row):
        avail = budget - fixed
        tm = max_tile_m if per_row <= 0 else max(avail // per_row, 0)
        tm = min(tm, max_tile_m)
        # >= 2 row tiles when M allows it, so both v7x TensorCores get work
        tm = min(tm, max(_ru(_cdiv(M, 2), row_mult), row_mult))
        tm = max((tm // row_mult) * row_mult, row_mult)
        return min(tm, _ru(M, row_mult))

    if not use_chunked:
        # -------- fully fused path: all weights resident, 1-D grid over row tiles --------
        per_row = 2 * lane[0] * xbytes + 2 * lane[-1] * obytes   # streamed x / out (2x buffered)
        per_row += max(lane[1:]) * 4                             # widest f32 matmul result
        per_row += lane[0] * cbytes                              # in-register cdt copy of x
        if n_layers >= 2:
            per_row += max(lane[1:-1]) * cbytes                  # cdt hidden feeding next layer
        tile_m = _solve_tile_m(fixed_resident, per_row)

        kernel = functools.partial(
            _ffn_resident_kernel, n_layers=n_layers, negative_slope=negative_slope,
            act_last=(n_layers == 1), compute_dtype=cdt)

        in_specs = [pl.BlockSpec((tile_m, dims[0]), lambda i: (i, 0))]
        inputs = [x2d]
        for li in range(n_layers):
            in_specs.append(pl.BlockSpec((dims[li], dims[li + 1]), lambda i: (0, 0)))
            in_specs.append(pl.BlockSpec((1, dims[li + 1]), lambda i: (0, 0)))
            inputs.append(ws[li])
            inputs.append(bs[li])

        out = pl.pallas_call(
            kernel,
            out_shape=jax.ShapeDtypeStruct((M, d_out), out_dtype),
            grid_spec=pltpu.PrefetchScalarGridSpec(
                num_scalar_prefetch=0,
                grid=(_cdiv(M, tile_m),),
                in_specs=in_specs,
                out_specs=pl.BlockSpec((tile_m, d_out), lambda i: (i, 0)),
            ),
            compiler_params=pltpu.CompilerParams(
                dimension_semantics=("parallel",),
                vmem_limit_bytes=int(vmem_limit),
            ),
            cost_estimate=cost,
        )(*inputs)
    else:
        # -------- hidden-dim-chunked path (n_layers == 2, weights too big to reside) -----
        d_hidden = dims[1]
        tile_h = hidden_chunk if hidden_chunk is not None else min(_ru(d_hidden, 128), 512)
        tile_h = max(_ru(int(tile_h), 128), 128)
        h_pad = _ru(d_hidden, tile_h)
        # pad ONLY the parameters along the hidden dim (cheap, numerically exact)
        w1 = jnp.pad(ws[0], ((0, 0), (0, h_pad - d_hidden)))
        b1 = jnp.pad(bs[0], ((0, 0), (0, h_pad - d_hidden)))
        w2 = jnp.pad(ws[1], ((0, h_pad - d_hidden), (0, 0)))
        b2 = bs[1]

        per_row = 2 * lane[0] * xbytes + 2 * lane[-1] * obytes   # streamed x / out
        per_row += lane[-1] * 4                                  # f32 accumulator scratch
        per_row += tile_h * 4 + tile_h * cbytes                  # f32 hidden chunk + cdt copy
        per_row += lane[0] * cbytes                              # cdt copy of x
        fixed = 2 * (_ru(dims[0], 8) * tile_h + tile_h * lane[-1]) * cbytes  # 2x-buffered W chunks
        fixed += 2 * 8 * (tile_h + lane[-1]) * 4                             # bias blocks
        tile_m = _solve_tile_m(fixed, per_row)

        kernel = functools.partial(_ffn2_chunked_kernel,
                                   negative_slope=negative_slope, compute_dtype=cdt)
        out = pl.pallas_call(
            kernel,
            out_shape=jax.ShapeDtypeStruct((M, d_out), out_dtype),
            grid_spec=pltpu.PrefetchScalarGridSpec(
                num_scalar_prefetch=0,
                grid=(_cdiv(M, tile_m), h_pad // tile_h),
                in_specs=[
                    pl.BlockSpec((tile_m, dims[0]), lambda i, h: (i, 0)),
                    pl.BlockSpec((dims[0], tile_h), lambda i, h: (0, h)),
                    pl.BlockSpec((1, tile_h), lambda i, h: (0, h)),
                    pl.BlockSpec((tile_h, d_out), lambda i, h: (h, 0)),
                    pl.BlockSpec((1, d_out), lambda i, h: (0, 0)),
                ],
                out_specs=pl.BlockSpec((tile_m, d_out), lambda i, h: (i, 0)),
                scratch_shapes=[pltpu.VMEM((tile_m, d_out), jnp.float32)],
            ),
            compiler_params=pltpu.CompilerParams(
                dimension_semantics=("parallel", "arbitrary"),
                vmem_limit_bytes=int(vmem_limit),
            ),
            cost_estimate=cost,
        )(x2d, w1, b1, w2, b2)

    return out.reshape(*lead, d_out)


# --------------------------------------------------------------------------------------
# Pure-JAX reference (matches the PyTorch module in eval mode)
# --------------------------------------------------------------------------------------
def _ref_ffn(x, ws, bs, slope=0.1):
    n = len(ws)
    if n == 0:
        return x
    hp = jax.lax.Precision.HIGHEST
    if n == 1:
        h = jnp.dot(x, ws[0], precision=hp) + bs[0]
        return jnp.where(h > 0, h, slope * h)
    h = x
    for i in range(n - 1):
        h = jnp.dot(h, ws[i], precision=hp) + bs[i]
        h = jnp.where(h > 0, h, slope * h)
    return jnp.dot(h, ws[-1], precision=hp) + bs[-1]


if __name__ == "__main__":
    batch, seq = 2, 8
    key = jax.random.PRNGKey(0)

    def make_params(key, dims):
        """torch.nn.Linear-like init: uniform +/- 1/sqrt(fan_in); weights are (d_in, d_out)."""
        ws, bs = [], []
        for i in range(len(dims) - 1):
            key, kw, kb = jax.random.split(key, 3)
            bound = 1.0 / float(dims[i]) ** 0.5
            ws.append(jax.random.uniform(kw, (dims[i], dims[i + 1]), jnp.float32, -bound, bound))
            bs.append(jax.random.uniform(kb, (1, dims[i + 1]), jnp.float32, -bound, bound))
        return key, ws, bs

    # Module config: d_input = d_hidden = d_output = 32, activation='LeakyReLU', n_layers=2.
    d = 32
    key, kx = jax.random.split(key)
    x = jax.random.normal(kx, (batch, seq, d), jnp.float32)
    key, ws, bs = make_params(key, [d, d, d])
    ref = _ref_ffn(x, ws, bs)

    # 1) exact f32 MXU path
    out_f32 = jax.block_until_ready(
        positionwise_feed_forward(x, ws, bs, compute_dtype=jnp.float32))
    assert out_f32.shape == (batch, seq, d)
    assert jnp.allclose(out_f32, ref, atol=1e-4, rtol=1e-4)

    # 2) default path: auto bf16 MXU feed, f32 accumulation (looser tolerance)
    out_auto = jax.block_until_ready(positionwise_feed_forward(x, ws, bs))
    assert jnp.allclose(out_auto, ref, atol=5e-2, rtol=5e-2)

    # 3) n_layers == 1 (activation applied to the single layer), unaligned d_out
    key, ws1, bs1 = make_params(key, [d, 48])
    out1 = jax.block_until_ready(
        positionwise_feed_forward(x, ws1, bs1, compute_dtype=jnp.float32))
    assert jnp.allclose(out1, _ref_ffn(x, ws1, bs1), atol=1e-4, rtol=1e-4)

    # 4) n_layers == 3 (middle d_hidden x d_hidden layer) + partial last row tile (M=14)
    x3 = x[:, :7, :]
    key, ws3, bs3 = make_params(key, [d, 64, 64, 40])
    out3 = jax.block_until_ready(
        positionwise_feed_forward(x3, ws3, bs3, compute_dtype=jnp.float32))
    assert out3.shape == (batch, 7, 40)
    assert jnp.allclose(out3, _ref_ffn(x3, ws3, bs3), atol=1e-4, rtol=1e-4)

    # 5) hidden-dim-chunked accumulator path (forced), n_layers == 2
    key, kx2 = jax.random.split(key)
    x2 = jax.random.normal(kx2, (batch, seq, 64), jnp.float32)
    key, wsc, bsc = make_params(key, [64, 256, 96])
    outc = jax.block_until_ready(positionwise_feed_forward(
        x2, wsc, bsc, compute_dtype=jnp.float32, hidden_chunk=128))
    assert outc.shape == (batch, seq, 96)
    assert jnp.allclose(outc, _ref_ffn(x2, wsc, bsc), atol=1e-4, rtol=1e-4)

    # 6) n_layers == 0 -> identity
    out0 = positionwise_feed_forward(x, [], [])
    assert out0 is x

    print("KERNEL_OK")
</pallas_src>

<mosaic_0001>
module attributes {stable_mosaic.version = 11 : i64} {
  func.func @_ffn_resident_kernel(%arg0: i32, %arg1: memref<8x32xf32, #tpu.memory_space<vmem>>, %arg2: memref<32x32xf32, #tpu.memory_space<vmem>>, %arg3: memref<1x32xf32, #tpu.memory_space<vmem>>, %arg4: memref<32x32xf32, #tpu.memory_space<vmem>>, %arg5: memref<1x32xf32, #tpu.memory_space<vmem>>, %arg6: memref<8x32xf32, #tpu.memory_space<vmem>>) attributes {dimension_semantics = [#tpu.dimension_semantics<parallel>], iteration_bounds = array<i64: 2>, scalar_prefetch = 0 : i64, scratch_operands = 0 : i64, tpu.core_type = #tpu.core_type<tc>, window_params = [{transform_indices = @transform_0, window_bounds = array<i64: 8, 32>}, {pipeline_mode = #tpu.pipeline_mode<synchronous>, transform_indices = @transform_1, window_bounds = array<i64: 32, 32>}, {pipeline_mode = #tpu.pipeline_mode<synchronous>, transform_indices = @transform_2, window_bounds = array<i64: 1, 32>}, {pipeline_mode = #tpu.pipeline_mode<synchronous>, transform_indices = @transform_3, window_bounds = array<i64: 32, 32>}, {pipeline_mode = #tpu.pipeline_mode<synchronous>, transform_indices = @transform_4, window_bounds = array<i64: 1, 32>}, {transform_indices = @transform_5, window_bounds = array<i64: 8, 32>}]} {
    %c0 = arith.constant 0 : index
    %c0_0 = arith.constant 0 : index
    %0 = vector.load %arg1[%c0, %c0_0] : memref<8x32xf32, #tpu.memory_space<vmem>>, vector<8x32xf32>
    %c0_1 = arith.constant 0 : index
    %c0_2 = arith.constant 0 : index
    %1 = vector.load %arg2[%c0_1, %c0_2] : memref<32x32xf32, #tpu.memory_space<vmem>>, vector<32x32xf32>
    %cst = arith.constant dense<0.000000e+00> : vector<8x32xf32>
    %2 = tpu.matmul %0, %1, %cst {dimension_numbers = #tpu.dot_dimension_numbers<[1], [0], [0], [1], [0, 0, 1, 1], [], []>} : vector<8x32xf32>, vector<32x32xf32>, vector<8x32xf32> -> vector<8x32xf32>
    %c0_3 = arith.constant 0 : index
    %c0_4 = arith.constant 0 : index
    %3 = vector.load %arg3[%c0_3, %c0_4] : memref<1x32xf32, #tpu.memory_space<vmem>>, vector<1x32xf32>
    %4 = vector.broadcast %3 : vector<1x32xf32> to vector<8x32xf32>
    %5 = arith.addf %2, %4 : vector<8x32xf32>
    %cst_5 = arith.constant 1.000000e-01 : f32
    %6 = vector.broadcast %cst_5 : f32 to vector<8x32xf32>
    %7 = arith.mulf %6, %5 : vector<8x32xf32>
    %8 = arith.maximumf %5, %7 : vector<8x32xf32>
    %c0_6 = arith.constant 0 : index
    %c0_7 = arith.constant 0 : index
    %9 = vector.load %arg4[%c0_6, %c0_7] : memref<32x32xf32, #tpu.memory_space<vmem>>, vector<32x32xf32>
    %cst_8 = arith.constant dense<0.000000e+00> : vector<8x32xf32>
    %10 = tpu.matmul %8, %9, %cst_8 {dimension_numbers = #tpu.dot_dimension_numbers<[1], [0], [0], [1], [0, 0, 1, 1], [], []>} : vector<8x32xf32>, vector<32x32xf32>, vector<8x32xf32> -> vector<8x32xf32>
    %c0_9 = arith.constant 0 : index
    %c0_10 = arith.constant 0 : index
    %11 = vector.load %arg5[%c0_9, %c0_10] : memref<1x32xf32, #tpu.memory_space<vmem>>, vector<1x32xf32>
    %12 = vector.broadcast %11 : vector<1x32xf32> to vector<8x32xf32>
    %13 = arith.addf %10, %12 : vector<8x32xf32>
    %c0_11 = arith.constant 0 : index
    %c0_12 = arith.constant 0 : index
    %14 = vector.load %arg6[%c0_11, %c0_12] : memref<8x32xf32, #tpu.memory_space<vmem>>, vector<8x32xf32>
    tpu.vector_store %arg6[%c0_11, %c0_12], %13 {strides = array<i32>} : memref<8x32xf32, #tpu.memory_space<vmem>>, vector<8x32xf32>,
    return
  }
  func.func @transform_0(%arg0: i32) -> (i32, i32) {
    %c0_i32 = arith.constant 0 : i32
    %c0_i32_0 = arith.constant 0 : i32
    return %arg0, %c0_i32 : i32, i32
  }
  func.func @transform_1(%arg0: i32) -> (i32, i32) {
    %c0_i32 = arith.constant 0 : i32
    %c0_i32_0 = arith.constant 0 : i32
    %c0_i32_1 = arith.constant 0 : i32
    return %c0_i32, %c0_i32_0 : i32, i32
  }
  func.func @transform_2(%arg0: i32) -> (i32, i32) {
    %c0_i32 = arith.constant 0 : i32
    %c0_i32_0 = arith.constant 0 : i32
    %c0_i32_1 = arith.constant 0 : i32
    return %c0_i32, %c0_i32_0 : i32, i32
  }
  func.func @transform_3(%arg0: i32) -> (i32, i32) {
    %c0_i32 = arith.constant 0 : i32
    %c0_i32_0 = arith.constant 0 : i32
    %c0_i32_1 = arith.constant 0 : i32
    return %c0_i32, %c0_i32_0 : i32, i32
  }
  func.func @transform_4(%arg0: i32) -> (i32, i32) {
    %c0_i32 = arith.constant 0 : i32
    %c0_i32_0 = arith.constant 0 : i32
    %c0_i32_1 = arith.constant 0 : i32
    return %c0_i32, %c0_i32_0 : i32, i32
  }
  func.func @transform_5(%arg0: i32) -> (i32, i32) {
    %c0_i32 = arith.constant 0 : i32
    %c0_i32_0 = arith.constant 0 : i32
    return %arg0, %c0_i32 : i32, i32
  }
}

</mosaic_0001>

<bundles_post_ra>
// kernel: tpu_custom_call.1
= control target key start
LH: loop header
LB: loop body
LE: loop exit
PB: predicated region body
PF: predicated region fallthrough
CT: control target
= control target key end

     0   :  { %10 = vsyncpa [#allocation3], 0  ;;  %s1040_s0 = inlined_call_operand.hbm [shape: f32[16,32], index: 0, kind: input, shape index: {}]   ;;  %s1041_s1 = inlined_call_operand.hbm [shape: f32[32,32], index: 1, kind: input, shape index: {}]   ;;  %s1042_s2 = inlined_call_operand.vmem [shape: f32[1,32], index: 2, kind: input, shape index: {}]   ;;  %s1043_s3 = inlined_call_operand.hbm [shape: f32[32,32], index: 3, kind: input, shape index: {}]   ;;  %s1044_s4 = inlined_call_operand.vmem [shape: f32[1,32], index: 4, kind: input, shape index: {}]   ;;  %s1045_s5 = inlined_call_operand.hbm [shape: f32[16,32], index: 5, kind: output, shape index: {}]  }
   0x1   :  { %12 = vsyncpa [#allocation3 + $0x1], 0 }
   0x2   :  { %13 = vsyncpa [#allocation6], 0 }
   0x3   :  { %14 = vsyncpa [#allocation4], 0 }
   0x4   :  { %16 = vsyncpa [#allocation4 + $0x1], 0  ;;  %s856_s18 = smov 0   ;;  %s858_s19 = smov 0  }
   0x5   :  { %s860_s20 = smov 0   ;;  %s862_s21 = smov 0  }
   0x6 LB: > { %s877_s22 = sadd.s32 4294967295, %s816_s21   ;;  %s545_s23 = sadd.s32 4294967294, %s816_s21   ;;  %s816_s21 = sphi %s862_s21, %s1067_s21   ;;  %s812_s20 = sphi %s860_s20, %s1066_s20   ;;  %s808_s19 = sphi %s858_s19, %s1065_s19   ;;  %s804_s18 = sphi %s856_s18, %s1064_s18  }
   0x7   : > { %p42_p0 = scmp.ne.s32.totalorder %s808_s19, %s804_s18  ;;  %p1046_p1 = scmp.eq.s32.totalorder %s877_s22, 0 }
   0x8   : > { %p156_p3 = scmp.eq.s32.totalorder %s545_s23, 1  ;;  %p546_p5 = scmp.ge.s32.totalorder %s816_s21, 1 }
   0x9   : > { %p886_p4 = por %p1046_p1, %p42_p0  ;;  %p163_p7 = scmp.lt.s32.totalorder %s816_s21, 3 }
   0xa   : > { %p891_p6 = por %p156_p3, %p42_p0  ;;  %s818_s27 = smov [#allocation5]  }
   0xb   : > { %s1050_s24 = scalar_select %p886_p4, 1, 0 }
   0xc   : > { %s1051_s25 = scalar_select %p891_p6, 1, 0 }
   0xd   : > { %p896_p8 = pnand %p546_p5, %p163_p7  ;;  %s175_s28 = sshll.u32 %s818_s27, 4  ;;  %s176_s28 = int_to_ptr.vmem [resolvable:$true] %s175_s28 }
   0xe   : > { %s819_s30 = smov [#allocation7]   ;;  %s679_s7 = scalar_lea.vmem %s176_s28, 512 }
   0xf   : > { %s1052_s26 = scalar_select %p896_p8, 1, 0 }
  0x10   : > { %p609_p9 = pneg %p896_p8  ;;  %s191_s6 = sshll.u32 %s819_s30, 4  ;;  %s192_s6 = int_to_ptr.vmem [resolvable:$true] %s191_s6 }
  0x11   : > { %p680_p13 = scmp.ne.s32.totalorder %s176_s28, %s679_s7  ;;  %p687_p5 = scmp.lt.s32.totalorder %s176_s28, %s176_s28 }
  0x12   : > { %p905_p11 = pnand %p609_p9, %p1046_p1  ;;  %p688_p7 = scmp.lt.s32.totalorder %s679_s7, %s679_s7 }
  0x14   : > { %p670_p12 = pneg %p905_p11  ;;  %p689_p10 = por %p688_p7, %p687_p5 }
  0x16   : > { %p682_p0 = pnand %p680_p13, %p670_p12 }
  0x18   : > { %p683_p3 = pneg %p682_p0 }
  0x1a   : > { %p690_p9 = pnand %p689_p10, %p683_p3 }
  0x1c   : > { %693 = shalt.err (!%p690_p9)
}
  0x1d   : > { %s820_s8 = smov 128   ;;  %s821_s9 = smov 8  }
  0x1e   : > { %612 = dma.hbm_to_vmem [thread:$0]  (!%p905_p11), %s1041_s1, 512, %s176_s28, [#allocation6], %s820_s8, %s820_s8, %s821_s9  }
  0x1f   : > { %s705_s12 = scalar_lea.vmem %s192_s6, 512  ;;  %p713_p2 = scmp.lt.s32.totalorder %s192_s6, %s192_s6 }
  0x20   : > { %p706_p1 = scmp.ne.s32.totalorder %s192_s6, %s705_s12  ;;  %p714_p6 = scmp.lt.s32.totalorder %s705_s12, %s705_s12 }
  0x22   : > { %p708_p13 = pnand %p706_p1, %p670_p12  ;;  %p715_p5 = por %p714_p6, %p713_p2 }
  0x24   : > { %p709_p0 = pneg %p708_p13 }
  0x26   : > { %p716_p10 = pnand %p715_p5, %p709_p0 }
  0x28   : > { %719 = shalt.err (!%p716_p10)
}
  0x29   : > { %615 = dma.hbm_to_vmem [thread:$0]  (!%p905_p11), %s1043_s3, 512, %s192_s6, [#allocation6], %s820_s8, %s820_s8, %s821_s9  }
  0x2a   : > { %s928_s15 = sadd.s32 1, %s816_s21   ;;  %s29_s16 = sadd.s32 1, %s812_s20 }
  0x2b   : > { %s26_s17 = ssub.s32 %s816_s21, %s928_s15  ;;  %p36_p1 = scmp.ne.s32.totalorder %s812_s20, %s808_s19 }
  0x2c   : > { %p27_p2 = scmp.eq.s32.totalorder %s26_s17, 0  ;;  %p37_p6 = scmp.eq.s32.totalorder %s816_s21, 0 }
  0x2d   : > { %p1054_p12 = scmp.eq.s32.totalorder %s877_s22, 1  ;;  %p626_p7 = scmp.lt.s32.totalorder %s816_s21, 2 }
  0x2e   : > { %s944_s27 = scalar_select %p27_p2, %s812_s20, %s29_s16  }
  0x2f   : > { %p938_p3 = por %p1054_p12, %p36_p1  ;;  %p38_p9 = por %p37_p6, %p36_p1 }
  0x30   : > { %s208_s28 = sand.u32 1, %s812_s20   ;;  %s551_s30 = sshll.u32 %s816_s21, 7 }
  0x31   : > { %s1055_s23 = scalar_select %p938_p3, 1, 0 }
  0x32   : > { %s550_s29 = sshll.u32 %s208_s28, 3  ;;  %s951_s8 = scalar_lea.hbm %s1040_s0, %s551_s30 }
  0x33   : > { %s212_s9 = scalar_lea.vmem [#allocation2], %s550_s29  ;;  %p953_p11 = pnand %p626_p7, %p38_p9 }
  0x34   : > { %s219_s10 = sshll.u32 %s212_s9, 4  ;;  %s209_s12 = scalar_lea.sflag [#allocation3], %s208_s28  ;;  %s220_s10 = int_to_ptr.vmem [resolvable:$true] %s219_s10 }
  0x35   : > { %s720_s13 = scalar_lea.hbm %s951_s8, 128  ;;  %p722_p0 = pneg %p953_p11 }
  0x36   : > { %p721_p13 = scmp.ne.s32.totalorder %s951_s8, %s720_s13  ;;  %s725_s17 = scalar_lea.hbm %s1040_s0, 256 }
  0x37   : > { %p726_p1 = scmp.lt.s32.totalorder %s951_s8, %s1040_s0  ;;  %p727_p2 = scmp.lt.s32.totalorder %s725_s17, %s720_s13 }
  0x38   : > { %p723_p5 = pnand %p722_p0, %p721_p13 }
  0x39   : > { %p728_p6 = por %p727_p2, %p726_p1 }
  0x3a   : > { %p724_p10 = pneg %p723_p5 }
  0x3c   : > { %p729_p12 = pnand %p728_p6, %p724_p10 }
  0x3e   : > { %732 = shalt.err (!%p729_p12)
}
  0x3f   : > { %s733_s6 = scalar_lea.vmem %s220_s10, 128  ;;  %s822_s28 = smov [#allocation2]  }
  0x40   : > { %p734_p7 = scmp.ne.s32.totalorder %s220_s10, %s733_s6  ;;  %s738_s7 = sshll.u32 %s822_s28, 4  ;;  %s739_s7 = int_to_ptr.vmem [resolvable:$false] %s738_s7 }
  0x41   : > { %s740_s9 = scalar_lea.vmem %s739_s7, 256  ;;  %p741_p13 = scmp.lt.s32.totalorder %s220_s10, %s739_s7 }
  0x42   : > { %p736_p9 = pnand %p734_p7, %p722_p0  ;;  %p742_p5 = scmp.lt.s32.totalorder %s740_s9, %s733_s6 }
  0x44   : > { %p737_p3 = pneg %p736_p9  ;;  %p743_p4 = por %p742_p5, %p741_p13 }
  0x46   : > { %p744_p8 = pnand %p743_p4, %p737_p3 }
  0x48   : > { %747 = shalt.err (!%p744_p8)
}
  0x49   : > { %619 = dma.hbm_to_vmem [thread:$0]  (!%p953_p11), %s951_s8, 128, %s220_s10, %s209_s12  }
  0x4a   : > { %p1057_p10 = scmp.ne.s32.totalorder %s1052_s26, 0 }
  0x4b   : > { %s974_s13 = sand.u32 (!%p1057_p10), 1, %s808_s19   ;;  %p1058_p4 = scmp.ne.s32.totalorder (!%p1057_p10), %s1050_s24, 0 }
  0x4c   : > { %228 = sbr.rel (%p1057_p10) target bundleno = 502 (0x1f6), region = 40  ;;  %s553_s14 = sshll.u32 (!%p1057_p10), %s974_s13, 3 }
  0x4d   : > { %s231_s16 = scalar_lea.sflag (!%p1057_p10), [#allocation3], %s974_s13  ;;  %s234_s17 = scalar_lea.vmem (!%p1057_p10), [#allocation2], %s553_s14 }
  0x51   : > { %791 = dma.done.wait (%p1058_p4), %s231_s16, 128  }
  0x52   : > { %793 = vsyncadd (%p1058_p4), %s231_s16, 4294967168  ;;  %p1059_p8 = scmp.eq.s32.totalorder %s877_s22, 0 }
  0x54   : > { %795 = dma.done.wait (%p1059_p8), [#allocation6], 1024   ;;  %p1060_p3 = pmov %p1059_p8 }
  0x55   : > { %v823_v0 = vmov 0.0   ;;  %vm824_vm0 = vmmov 0   ;;  %v273_v1 = vld [vmem:[#allocation5 + $0x18] sm:$0xff]  ;;  %v272_v2 = vld [vmem:[#allocation5 + $0x10] sm:$0xff]  ;;  %v271_v3 = vld [vmem:[#allocation5 + $0x8] sm:$0xff]  ;;  %vm281_vm1 = vcmask 261120  }
  0x56   : > { %797 = vsyncadd (%p1060_p3), [#allocation6], 4294966272  ;;  %575 = vmatprep.subr.mxu0 %v823_v0  ;;  %583 = vmatprep.mubr.msk.f32.mxu0 %vm824_vm0, %v823_v0  ;;  %v270_v4 = vld [vmem:[#allocation5] sm:$0xff]  ;;  %v269_v5 = vld [vmem:[%s234_s17] sm:$0xff]  ;;  %s562_s11 = sshll.u32 %s877_s22, 7  ;;  %s268_s12 = scalar_lea.vmem [#allocation8], %s553_s14 }
  0x57   : > { %586 = vmatprep.subr.mxu1 %v823_v0  ;;  %594 = vmatprep.mubr.msk.f32.mxu1 %vm824_vm0, %v823_v0  ;;  %v360_v6 = vld [vmem:[#allocation7 + $0x18] sm:$0xff]  ;;  %v359_v7 = vld [vmem:[#allocation7 + $0x10] sm:$0xff]  ;;  %v358_v8 = vld [vmem:[#allocation7 + $0x8] sm:$0xff]  ;;  %s456_s30 = sshll.u32 %s268_s12, 4  ;;  %s1002_s28 = scalar_lea.hbm %s1045_s5, %s562_s11  ;;  %s457_s30 = int_to_ptr.vmem [resolvable:$true] %s456_s30 }
  0x58   : > { %576 = vmatpush3.msra.mxu0 %v273_v1  ;;  %587 = vmatpush3.msra.mxu1 %v360_v6  ;;  %v357_v9 = vld [vmem:[#allocation7] sm:$0xff]  ;;  %v557_v10 = vld [vmem:[%s1042_s2] ss:$0 sm:$0xff]  ;;  %s443_s7 = scalar_lea.sflag [#allocation4], %s974_s13  ;;  %s748_s9 = scalar_lea.vmem %s457_s30, 128 }
  0x59   : > { %577 = vmatprep.subr.mxu0 %v823_v0  ;;  %588 = vmatprep.subr.mxu1 %v823_v0  ;;  %v559_v16 = vld [vmem:[%s1044_s4] ss:$0 sm:$0xff]  ;;  %p749_p11 = scmp.ne.s32.totalorder %s457_s30, %s748_s9  ;;  %p1061_p0 = scmp.ne.s32.totalorder %s1055_s23, 0 }
  0x5a   : > { %578 = vmatpush3.msra.mxu0 %v272_v2  ;;  %589 = vmatpush3.msra.mxu1 %v359_v7  ;;  %s825_s22 = smov [#allocation8]  }
  0x5b   : > { %579 = vmatprep.subr.mxu0 %v823_v0  ;;  %590 = vmatprep.subr.mxu1 %v823_v0  ;;  %p750_p1 = pnand %p749_p11, %p1061_p0  ;;  %s752_s14 = sshll.u32 %s825_s22, 4  ;;  %s753_s14 = int_to_ptr.vmem [resolvable:$false] %s752_s14 }
  0x5c   : > { %580 = vmatpush3.msra.mxu0 %v271_v3  ;;  %591 = vmatpush3.msra.mxu1 %v358_v8  ;;  %s754_s16 = scalar_lea.vmem %s753_s14, 256  ;;  %p755_p6 = scmp.lt.s32.totalorder %s457_s30, %s753_s14 }
  0x5d   : > { %581 = vmatprep.subr.mxu0 %v823_v0  ;;  %592 = vmatprep.subr.mxu1 %v823_v0  ;;  %p751_p2 = pneg %p750_p1  ;;  %p756_p12 = scmp.lt.s32.totalorder %s754_s16, %s748_s9 }
  0x5e   : > { %582 = vmatpush3.msra.mxu0 %v270_v4  ;;  %593 = vmatpush3.msra.mxu1 %v357_v9 }
  0x5f   : > { %584 = vmatmul.mubr.msk.f32.vlgmr.msra.gmra.mxu0 %vm281_vm1, %v269_v5  ;;  %p757_p7 = por %p756_p12, %p755_p6 }
  0x61   : > { %p758_p9 = pnand %p757_p7, %p751_p2 }
 0x11f   : > { %v351_v11 = vpop.f32.mrf.mxu0 }
 0x120   : > { %v352_v12 = vadd.f32 %v557_v10, %v351_v11 }
 0x121   : > { %v585_v13 = vpop.f32.mrf.mxu0 }
 0x122   : > { %v355_v14 = vmul.f32 0.1, %v352_v12 }
 0x124   : > { %v356_v15 = vmax.f32 %v352_v12, %v355_v14 }
 0x126   : > { %595 = vmatmul.mubr.msk.f32.vlgmr.msra.gmra.mxu1 %vm281_vm1, %v356_v15 }
 0x1e6   : > { %v437_v17 = vpop.f32.mrf.mxu1 }
 0x1e7   : > { %v438_v18 = vadd.f32 %v559_v16, %v437_v17 }
 0x1e8   : > { %v596_v19 = vpop.f32.mrf.mxu1 }
 0x1e9   : > { %441 = vst.msk [vmem:[%s268_s12] sm:$0xff] %vm281_vm1, %v438_v18 }
 0x1ea   : > { %761 = shalt.err (!%p758_p9)
}
 0x1eb   : > { %s762_s17 = scalar_lea.hbm %s1002_s28, 128  ;;  %s766_s26 = scalar_lea.hbm %s1045_s5, 256 }
 0x1ec   : > { %p763_p13 = scmp.ne.s32.totalorder %s1002_s28, %s762_s17  ;;  %p767_p4 = scmp.lt.s32.totalorder %s1002_s28, %s1045_s5 }
 0x1ed   : > { %p768_p8 = scmp.lt.s32.totalorder %s766_s26, %s762_s17 }
 0x1ee   : > { %p764_p5 = pnand %p763_p13, %p1061_p0 }
 0x1ef   : > { %p769_p3 = por %p768_p8, %p767_p4 }
 0x1f0   : > { %p765_p10 = pneg %p764_p5 }
 0x1f2   : > { %p770_p11 = pnand %p769_p3, %p765_p10 }
 0x1f4   : > { %773 = shalt.err (!%p770_p11)
}
 0x1f5   : > { %607 = dma.vmem_to_hbm [thread:$0]  (%p1061_p0), %s457_s30, 128, %s1002_s28, %s443_s7  }
 0x1f6 PF: > { %s468_s11 = sand.u32 1, %s804_s18   ;;  %p1062_p1 = scmp.ne.s32.totalorder %s1051_s25, 0 }
 0x1f7   : > { %p1063_p2 = scmp.ge.s32.totalorder %s816_s21, 2  ;;  %s469_s12 = scalar_lea.sflag [#allocation4], %s468_s11 }
 0x1f9   : > { %p621_p6 = pnand %p1063_p2, %p1062_p1 }
 0x1fb   : > { %p622_p12 = pneg %p621_p6 }
 0x1fd   : > { %799 = dma.done.wait (%p622_p12), %s469_s12, 128  }
 0x1fe   : > { %801 = vsyncadd (%p622_p12), %s469_s12, 4294967168  ;;  %p19_p7 = scmp.ge.s32.totalorder %s928_s15, 4   ;;  %s1064_s18 = smov %s808_s19 }
 0x1ff   : > { %s1065_s19 = smov %s812_s20  ;;  %s1066_s20 = smov %s944_s27 }
 0x200   : > { %s1067_s21 = smov %s928_s15  ;;  %21 = sbr.rel (!%p19_p7) target bundleno = 6 (0x6), region = 93 }
 0x205   :  { %474 = vsyncpa [#allocation3], 1 }
 0x206   :  { %476 = vsyncpa [#allocation3 + $0x1], 1 }
 0x207   :  { %477 = vsyncpa [#allocation6], 1 }
 0x208   :  { %478 = vsyncpa [#allocation4], 1 }
 0x209   :  { %480 = vsyncpa [#allocation4 + $0x1], 1 }

</bundles_post_ra>
